<compile_context>
chip_gen: v7x
topology: tpu7x:2x2x1
jax: 0.10.0
libtpu: 0.0.40
codegen_flags: <defaults>
</compile_context>

<pallas_src>
import jax
import jax.numpy as jnp
from jax.experimental import pallas as pl
from jax.experimental.pallas import tpu as pltpu

BN_EPS = 1e-5


def _round_up(x, m):
    return ((x + m - 1) // m) * m


def _mlp_kernel(x_ref, w1_ref, b1_ref, w2_ref, b2_ref, w3_ref, b3_ref, o_ref):
    # x arrives f32; cast to the matmul dtype in-kernel (VPU op hidden under
    # the MXU) instead of paying a separate XLA cast + extra HBM round trip.
    x = x_ref[...].astype(w1_ref.dtype)

    # ---- Linear(H -> 2H) + ReLU.  (BN1 folded into w2/b2; Dropout = identity in eval.)
    h = jnp.dot(x, w1_ref[...], preferred_element_type=jnp.float32) + b1_ref[...]
    h = jnp.maximum(h, 0.0)

    # ---- Linear(2H -> H) with BN1 pre-folded, + ReLU.  (BN2 folded into w3/b3.)
    h = jnp.dot(h.astype(w2_ref.dtype), w2_ref[...],
                preferred_element_type=jnp.float32) + b2_ref[...]
    h = jnp.maximum(h, 0.0)

    # ---- Linear(H -> 1): VPU multiply + lane reduction (MXU stays free),
    # stored as a lane-dense (1, TB) row (unmasked vst) rather than (TB, 1).
    row = jnp.sum(h * w3_ref[...], axis=-1)                     # (TB,)
    logits = row[None, :] + b3_ref[...]                          # (1, TB)

    # Exact sigmoid: exp lands on the EUP; the (1, TB) divide is tiny and keeps
    # the output strictly inside [0, 1].
    o_ref[0] = (1.0 / (1.0 + jnp.exp(-logits))).astype(o_ref.dtype)


def basemodel_forward(x, params, *, tile_b=512, matmul_dtype=jnp.bfloat16):
    """Eval-mode forward. x: [B, H] float32. params: dict (see init_params)."""
    B, H = x.shape
    H2 = 2 * H

    # ---- One-time parameter prep: fold BN (running stats + affine) into the
    # downstream Linear.  ReLU precedes BN, so the fold happens AFTER the max:
    #   relu(z)*s + t  feeding a Linear  =>  W' = s[:,None]*W , b' = b + t @ W.
    s1 = params["g1"] * jax.lax.rsqrt(params["rv1"] + BN_EPS)        # (1, 2H)
    t1 = params["be1"] - params["rm1"] * s1
    s2 = params["g2"] * jax.lax.rsqrt(params["rv2"] + BN_EPS)        # (1, H)
    t2 = params["be2"] - params["rm2"] * s2

    w1 = params["w1"].astype(matmul_dtype)                           # (H, 2H) bf16
    b1 = params["b1"]                                                # (1, 2H) f32
    w2 = (s1.reshape(H2, 1) * params["w2"]).astype(matmul_dtype)     # (2H, H) bf16 (scaled in f32)
    b2 = params["b2"] + t1 @ params["w2"]                            # (1, H)  f32
    w3 = (s2 * params["w3"].reshape(1, H)).astype(jnp.float32)       # (1, H)  f32 (VPU head)
    b3 = params["b3"] + t2 @ params["w3"]                            # (1, 1)  f32

    # ---- Batch tiling: TB multiple of 8; guarantee >= 2 tiles for mid-size B
    # so v7x's two TensorCores both run (no-op on single-TC v5e/v6e).
    tb = min(_round_up(tile_b, 8), _round_up(B, 8))
    if B >= 256 and _round_up(B, tb) // tb < 2:
        tb = max(128, _round_up(pl.cdiv(B, 2), 8))
    b_pad = _round_up(B, tb)
    num_tiles = b_pad // tb

    xp = x                                   # stays f32; cast happens in-kernel
    if b_pad != B:
        # Ragged tail only: pad so every tile is full (extra rows discarded).
        xp = jnp.pad(xp, ((0, b_pad - B), (0, 0)))

    weight_args = (w1, b1, w2, b2, w3, b3)
    args = (xp,) + weight_args

    def _bytes(a):
        return a.size * jnp.dtype(a.dtype).itemsize

    # VMEM budget: resident weights (x2 in case the single-buffer request is
    # ignored) + activation/tile footprint, with headroom under v7x's 64 MiB.
    resident = sum(_bytes(a) for a in weight_args)
    tile_act = tb * (H2 + H) * 4 + tb * H * (4 + 2) + tb * 4
    vmem_limit = int(min(max(2 * resident + 3 * tile_act + (1 << 20), 16 << 20), 48 << 20))

    flops = 2 * B * H * H2 + 2 * B * H2 * H + 2 * B * H
    bytes_accessed = _bytes(xp) + resident + b_pad * 4
    cost = pl.CostEstimate(flops=int(flops), transcendentals=int(B),
                           bytes_accessed=int(bytes_accessed))

    # Output laid out lane-dense: (num_tiles, 1, TB) rows, reshaped back below.
    out_shape = jax.ShapeDtypeStruct((num_tiles, 1, tb), jnp.float32)
    out_spec = pl.BlockSpec((1, 1, tb), lambda i: (i, 0, 0))
    x_spec = pl.BlockSpec((tb, H), lambda i: (i, 0))

    def _run(single_buffer_weights):
        if single_buffer_weights:
            # Constant-index resident blocks don't need double-buffering.
            w_specs = [pl.BlockSpec(a.shape, lambda i: (0, 0),
                                    pipeline_mode=pl.Buffered(1))
                       for a in weight_args]
        else:
            w_specs = [pl.BlockSpec(a.shape, lambda i: (0, 0)) for a in weight_args]
        return pl.pallas_call(
            _mlp_kernel,
            out_shape=out_shape,
            grid=(num_tiles,),
            in_specs=[x_spec] + w_specs,
            out_specs=out_spec,
            compiler_params=pltpu.CompilerParams(
                dimension_semantics=("parallel",),
                vmem_limit_bytes=vmem_limit),
            cost_estimate=cost,
        )(*args)

    try:
        out = _run(True)
    except Exception:
        # Fallback if this JAX/Mosaic build rejects single-buffered blocks.
        out = _run(False)

    return out.reshape(b_pad)[:B].reshape(B, 1)


def basemodel_reference(x, params):
    """Pure-JAX f32 reference of the eval-mode forward (for verification)."""
    h = x @ params["w1"] + params["b1"]
    h = jnp.maximum(h, 0.0)
    h = (h - params["rm1"]) * jax.lax.rsqrt(params["rv1"] + BN_EPS) * params["g1"] + params["be1"]
    h = h @ params["w2"] + params["b2"]
    h = jnp.maximum(h, 0.0)
    h = (h - params["rm2"]) * jax.lax.rsqrt(params["rv2"] + BN_EPS) * params["g2"] + params["be2"]
    logits = h @ params["w3"] + params["b3"]
    return jax.nn.sigmoid(logits)


def init_params(key, hidden_dim):
    """Deterministic synthetic parameters matching the PyTorch module shapes."""
    H, H2 = hidden_dim, 2 * hidden_dim
    ks = jax.random.split(key, 6)

    def lin(kw, kb, fan_in, fan_out):
        bound = 1.0 / jnp.sqrt(fan_in)
        w = jax.random.uniform(kw, (fan_in, fan_out), jnp.float32, -bound, bound)
        b = jax.random.uniform(kb, (1, fan_out), jnp.float32, -bound, bound)
        return w, b

    w1, b1 = lin(ks[0], ks[1], H, H2)
    w2, b2 = lin(ks[2], ks[3], H2, H)
    w3, b3 = lin(ks[4], ks[5], H, 1)

    return dict(
        w1=w1, b1=b1,
        g1=jnp.ones((1, H2), jnp.float32), be1=jnp.zeros((1, H2), jnp.float32),
        rm1=jnp.zeros((1, H2), jnp.float32), rv1=jnp.ones((1, H2), jnp.float32),
        w2=w2, b2=b2,
        g2=jnp.ones((1, H), jnp.float32), be2=jnp.zeros((1, H), jnp.float32),
        rm2=jnp.zeros((1, H), jnp.float32), rv2=jnp.ones((1, H), jnp.float32),
        w3=w3, b3=b3,
    )


if __name__ == "__main__":
    key = jax.random.PRNGKey(0)
    kx, kp = jax.random.split(key)

    B, H = 8, 32
    x = jax.random.normal(kx, (B, H), jnp.float32)
    params = init_params(kp, H)

    out = basemodel_forward(x, params)
    jax.block_until_ready(out)

    ref = basemodel_reference(x, params)
    assert out.shape == (B, 1)
    assert bool(jnp.all((out >= 0.0) & (out <= 1.0)))
    assert bool(jnp.max(jnp.abs(out - ref)) < 5e-2), "mismatch vs f32 reference"
    print("KERNEL_OK")
</pallas_src>

<mosaic_0001>
module attributes {stable_mosaic.version = 11 : i64} {
  func.func @_mlp_kernel(%arg0: i32, %arg1: memref<8x32xf32, #tpu.memory_space<vmem>>, %arg2: memref<32x64xbf16, #tpu.memory_space<vmem>>, %arg3: memref<1x64xf32, #tpu.memory_space<vmem>>, %arg4: memref<64x32xbf16, #tpu.memory_space<vmem>>, %arg5: memref<1x32xf32, #tpu.memory_space<vmem>>, %arg6: memref<1x32xf32, #tpu.memory_space<vmem>>, %arg7: memref<1x1xf32, #tpu.memory_space<vmem>>, %arg8: memref<1x1x8xf32, #tpu.memory_space<vmem>>) attributes {dimension_semantics = [#tpu.dimension_semantics<parallel>], iteration_bounds = array<i64: 1>, scalar_prefetch = 0 : i64, scratch_operands = 0 : i64, tpu.core_type = #tpu.core_type<tc>, window_params = [{transform_indices = @transform_0, window_bounds = array<i64: 8, 32>}, {pipeline_mode = #tpu.pipeline_mode<synchronous>, transform_indices = @transform_1, window_bounds = array<i64: 32, 64>}, {pipeline_mode = #tpu.pipeline_mode<synchronous>, transform_indices = @transform_2, window_bounds = array<i64: 1, 64>}, {pipeline_mode = #tpu.pipeline_mode<synchronous>, transform_indices = @transform_3, window_bounds = array<i64: 64, 32>}, {pipeline_mode = #tpu.pipeline_mode<synchronous>, transform_indices = @transform_4, window_bounds = array<i64: 1, 32>}, {pipeline_mode = #tpu.pipeline_mode<synchronous>, transform_indices = @transform_5, window_bounds = array<i64: 1, 32>}, {pipeline_mode = #tpu.pipeline_mode<synchronous>, transform_indices = @transform_6, window_bounds = array<i64: 1, 1>}, {transform_indices = @transform_7, window_bounds = array<i64: 1, 1, 8>}]} {
    %c0 = arith.constant 0 : index
    %c0_0 = arith.constant 0 : index
    %0 = vector.load %arg1[%c0, %c0_0] : memref<8x32xf32, #tpu.memory_space<vmem>>, vector<8x32xf32>
    %1 = arith.truncf %0 : vector<8x32xf32> to vector<8x32xbf16>
    %c0_1 = arith.constant 0 : index
    %c0_2 = arith.constant 0 : index
    %2 = vector.load %arg2[%c0_1, %c0_2] : memref<32x64xbf16, #tpu.memory_space<vmem>>, vector<32x64xbf16>
    %cst = arith.constant dense<0.000000e+00> : vector<8x64xf32>
    %3 = tpu.matmul %1, %2, %cst {dimension_numbers = #tpu.dot_dimension_numbers<[1], [0], [0], [1], [0, 0, 1, 1], [], []>} : vector<8x32xbf16>, vector<32x64xbf16>, vector<8x64xf32> -> vector<8x64xf32>
    %c0_3 = arith.constant 0 : index
    %c0_4 = arith.constant 0 : index
    %4 = vector.load %arg3[%c0_3, %c0_4] : memref<1x64xf32, #tpu.memory_space<vmem>>, vector<1x64xf32>
    %5 = vector.broadcast %4 : vector<1x64xf32> to vector<8x64xf32>
    %6 = arith.addf %3, %5 : vector<8x64xf32>
    %cst_5 = arith.constant 0.000000e+00 : f32
    %7 = vector.broadcast %cst_5 : f32 to vector<8x64xf32>
    %8 = arith.maximumf %6, %7 : vector<8x64xf32>
    %9 = arith.truncf %8 : vector<8x64xf32> to vector<8x64xbf16>
    %c0_6 = arith.constant 0 : index
    %c0_7 = arith.constant 0 : index
    %10 = vector.load %arg4[%c0_6, %c0_7] : memref<64x32xbf16, #tpu.memory_space<vmem>>, vector<64x32xbf16>
    %cst_8 = arith.constant dense<0.000000e+00> : vector<8x32xf32>
    %11 = tpu.matmul %9, %10, %cst_8 {dimension_numbers = #tpu.dot_dimension_numbers<[1], [0], [0], [1], [0, 0, 1, 1], [], []>} : vector<8x64xbf16>, vector<64x32xbf16>, vector<8x32xf32> -> vector<8x32xf32>
    %c0_9 = arith.constant 0 : index
    %c0_10 = arith.constant 0 : index
    %12 = vector.load %arg5[%c0_9, %c0_10] : memref<1x32xf32, #tpu.memory_space<vmem>>, vector<1x32xf32>
    %13 = vector.broadcast %12 : vector<1x32xf32> to vector<8x32xf32>
    %14 = arith.addf %11, %13 : vector<8x32xf32>
    %cst_11 = arith.constant 0.000000e+00 : f32
    %15 = vector.broadcast %cst_11 : f32 to vector<8x32xf32>
    %16 = arith.maximumf %14, %15 : vector<8x32xf32>
    %c0_12 = arith.constant 0 : index
    %c0_13 = arith.constant 0 : index
    %17 = vector.load %arg6[%c0_12, %c0_13] : memref<1x32xf32, #tpu.memory_space<vmem>>, vector<1x32xf32>
    %18 = vector.broadcast %17 : vector<1x32xf32> to vector<8x32xf32>
    %19 = arith.mulf %16, %18 : vector<8x32xf32>
    %cst_14 = arith.constant dense<0.000000e+00> : vector<8xf32>
    %20 = vector.multi_reduction <add>, %19, %cst_14 [1] : vector<8x32xf32> to vector<8xf32>
    %21 = vector.shape_cast %20 : vector<8xf32> to vector<1x8xf32>
    %c0_15 = arith.constant 0 : index
    %c0_16 = arith.constant 0 : index
    %22 = vector.load %arg7[%c0_15, %c0_16] : memref<1x1xf32, #tpu.memory_space<vmem>>, vector<1x1xf32>
    %23 = vector.broadcast %22 : vector<1x1xf32> to vector<1x8xf32>
    %24 = arith.addf %21, %23 : vector<1x8xf32>
    %cst_17 = arith.constant 0.000000e+00 : f32
    %25 = vector.broadcast %cst_17 : f32 to vector<1x8xf32>
    %26 = arith.subf %25, %24 : vector<1x8xf32>
    %27 = math.exp %26 : vector<1x8xf32>
    %cst_18 = arith.constant 1.000000e+00 : f32
    %28 = vector.broadcast %cst_18 : f32 to vector<1x8xf32>
    %29 = arith.addf %28, %27 : vector<1x8xf32>
    %cst_19 = arith.constant 1.000000e+00 : f32
    %30 = vector.broadcast %cst_19 : f32 to vector<1x8xf32>
    %31 = arith.divf %30, %29 : vector<1x8xf32>
    %c0_20 = arith.constant 0 : index
    %c0_21 = arith.constant 0 : index
    %c0_22 = arith.constant 0 : index
    %32 = vector.load %arg8[%c0_20, %c0_21, %c0_22] : memref<1x1x8xf32, #tpu.memory_space<vmem>>, vector<1x1x8xf32>
    %33 = vector.shape_cast %32 : vector<1x1x8xf32> to vector<1x8xf32>
    %34 = vector.shape_cast %31 : vector<1x8xf32> to vector<1x1x8xf32>
    tpu.vector_store %arg8[%c0_20, %c0_21, %c0_22], %34 {strides = array<i32>} : memref<1x1x8xf32, #tpu.memory_space<vmem>>, vector<1x1x8xf32>,
    return
  }
  func.func @transform_0(%arg0: i32) -> (i32, i32) {
    %c0_i32 = arith.constant 0 : i32
    %c0_i32_0 = arith.constant 0 : i32
    return %arg0, %c0_i32 : i32, i32
  }
  func.func @transform_1(%arg0: i32) -> (i32, i32) {
    %c0_i32 = arith.constant 0 : i32
    %c0_i32_0 = arith.constant 0 : i32
    %c0_i32_1 = arith.constant 0 : i32
    return %c0_i32, %c0_i32_0 : i32, i32
  }
  func.func @transform_2(%arg0: i32) -> (i32, i32) {
    %c0_i32 = arith.constant 0 : i32
    %c0_i32_0 = arith.constant 0 : i32
    %c0_i32_1 = arith.constant 0 : i32
    return %c0_i32, %c0_i32_0 : i32, i32
  }
  func.func @transform_3(%arg0: i32) -> (i32, i32) {
    %c0_i32 = arith.constant 0 : i32
    %c0_i32_0 = arith.constant 0 : i32
    %c0_i32_1 = arith.constant 0 : i32
    return %c0_i32, %c0_i32_0 : i32, i32
  }
  func.func @transform_4(%arg0: i32) -> (i32, i32) {
    %c0_i32 = arith.constant 0 : i32
    %c0_i32_0 = arith.constant 0 : i32
    %c0_i32_1 = arith.constant 0 : i32
    return %c0_i32, %c0_i32_0 : i32, i32
  }
  func.func @transform_5(%arg0: i32) -> (i32, i32) {
    %c0_i32 = arith.constant 0 : i32
    %c0_i32_0 = arith.constant 0 : i32
    %c0_i32_1 = arith.constant 0 : i32
    return %c0_i32, %c0_i32_0 : i32, i32
  }
  func.func @transform_6(%arg0: i32) -> (i32, i32) {
    %c0_i32 = arith.constant 0 : i32
    %c0_i32_0 = arith.constant 0 : i32
    %c0_i32_1 = arith.constant 0 : i32
    return %c0_i32, %c0_i32_0 : i32, i32
  }
  func.func @transform_7(%arg0: i32) -> (i32, i32, i32) {
    %c0_i32 = arith.constant 0 : i32
    %c0_i32_0 = arith.constant 0 : i32
    %c0_i32_1 = arith.constant 0 : i32
    return %arg0, %c0_i32, %c0_i32_0 : i32, i32, i32
  }
}

module attributes {stable_mosaic.version = 11 : i64} {
  func.func @_mlp_kernel(%arg0: i32, %arg1: memref<8x32xf32, #tpu.memory_space<vmem>>, %arg2: memref<32x64xbf16, #tpu.memory_space<vmem>>, %arg3: memref<1x64xf32, #tpu.memory_space<vmem>>, %arg4: memref<64x32xbf16, #tpu.memory_space<vmem>>, %arg5: memref<1x32xf32, #tpu.memory_space<vmem>>, %arg6: memref<1x32xf32, #tpu.memory_space<vmem>>, %arg7: memref<1x1xf32, #tpu.memory_space<vmem>>, %arg8: memref<1x1x8xf32, #tpu.memory_space<vmem>>) attributes {dimension_semantics = [#tpu.dimension_semantics<parallel>], iteration_bounds = array<i64: 1>, scalar_prefetch = 0 : i64, scratch_operands = 0 : i64, tpu.core_type = #tpu.core_type<tc>, window_params = [{transform_indices = @transform_0, window_bounds = array<i64: 8, 32>}, {pipeline_mode = #tpu.pipeline_mode<synchronous>, transform_indices = @transform_1, window_bounds = array<i64: 32, 64>}, {pipeline_mode = #tpu.pipeline_mode<synchronous>, transform_indices = @transform_2, window_bounds = array<i64: 1, 64>}, {pipeline_mode = #tpu.pipeline_mode<synchronous>, transform_indices = @transform_3, window_bounds = array<i64: 64, 32>}, {pipeline_mode = #tpu.pipeline_mode<synchronous>, transform_indices = @transform_4, window_bounds = array<i64: 1, 32>}, {pipeline_mode = #tpu.pipeline_mode<synchronous>, transform_indices = @transform_5, window_bounds = array<i64: 1, 32>}, {pipeline_mode = #tpu.pipeline_mode<synchronous>, transform_indices = @transform_6, window_bounds = array<i64: 1, 1>}, {transform_indices = @transform_7, window_bounds = array<i64: 1, 1, 8>}]} {
    %c0 = arith.constant 0 : index
    %c0_0 = arith.constant 0 : index
    %0 = vector.load %arg1[%c0, %c0_0] : memref<8x32xf32, #tpu.memory_space<vmem>>, vector<8x32xf32>
    %1 = arith.truncf %0 : vector<8x32xf32> to vector<8x32xbf16>
    %c0_1 = arith.constant 0 : index
    %c0_2 = arith.constant 0 : index
    %2 = vector.load %arg2[%c0_1, %c0_2] : memref<32x64xbf16, #tpu.memory_space<vmem>>, vector<32x64xbf16>
    %cst = arith.constant dense<0.000000e+00> : vector<8x64xf32>
    %3 = tpu.matmul %1, %2, %cst {dimension_numbers = #tpu.dot_dimension_numbers<[1], [0], [0], [1], [0, 0, 1, 1], [], []>} : vector<8x32xbf16>, vector<32x64xbf16>, vector<8x64xf32> -> vector<8x64xf32>
    %c0_3 = arith.constant 0 : index
    %c0_4 = arith.constant 0 : index
    %4 = vector.load %arg3[%c0_3, %c0_4] : memref<1x64xf32, #tpu.memory_space<vmem>>, vector<1x64xf32>
    %5 = vector.broadcast %4 : vector<1x64xf32> to vector<8x64xf32>
    %6 = arith.addf %3, %5 : vector<8x64xf32>
    %cst_5 = arith.constant 0.000000e+00 : f32
    %7 = vector.broadcast %cst_5 : f32 to vector<8x64xf32>
    %8 = arith.maximumf %6, %7 : vector<8x64xf32>
    %9 = arith.truncf %8 : vector<8x64xf32> to vector<8x64xbf16>
    %c0_6 = arith.constant 0 : index
    %c0_7 = arith.constant 0 : index
    %10 = vector.load %arg4[%c0_6, %c0_7] : memref<64x32xbf16, #tpu.memory_space<vmem>>, vector<64x32xbf16>
    %cst_8 = arith.constant dense<0.000000e+00> : vector<8x32xf32>
    %11 = tpu.matmul %9, %10, %cst_8 {dimension_numbers = #tpu.dot_dimension_numbers<[1], [0], [0], [1], [0, 0, 1, 1], [], []>} : vector<8x64xbf16>, vector<64x32xbf16>, vector<8x32xf32> -> vector<8x32xf32>
    %c0_9 = arith.constant 0 : index
    %c0_10 = arith.constant 0 : index
    %12 = vector.load %arg5[%c0_9, %c0_10] : memref<1x32xf32, #tpu.memory_space<vmem>>, vector<1x32xf32>
    %13 = vector.broadcast %12 : vector<1x32xf32> to vector<8x32xf32>
    %14 = arith.addf %11, %13 : vector<8x32xf32>
    %cst_11 = arith.constant 0.000000e+00 : f32
    %15 = vector.broadcast %cst_11 : f32 to vector<8x32xf32>
    %16 = arith.maximumf %14, %15 : vector<8x32xf32>
    %c0_12 = arith.constant 0 : index
    %c0_13 = arith.constant 0 : index
    %17 = vector.load %arg6[%c0_12, %c0_13] : memref<1x32xf32, #tpu.memory_space<vmem>>, vector<1x32xf32>
    %18 = vector.broadcast %17 : vector<1x32xf32> to vector<8x32xf32>
    %19 = arith.mulf %16, %18 : vector<8x32xf32>
    %cst_14 = arith.constant dense<0.000000e+00> : vector<8xf32>
    %20 = vector.multi_reduction <add>, %19, %cst_14 [1] : vector<8x32xf32> to vector<8xf32>
    %21 = vector.shape_cast %20 : vector<8xf32> to vector<1x8xf32>
    %c0_15 = arith.constant 0 : index
    %c0_16 = arith.constant 0 : index
    %22 = vector.load %arg7[%c0_15, %c0_16] : memref<1x1xf32, #tpu.memory_space<vmem>>, vector<1x1xf32>
    %23 = vector.broadcast %22 : vector<1x1xf32> to vector<1x8xf32>
    %24 = arith.addf %21, %23 : vector<1x8xf32>
    %cst_17 = arith.constant 0.000000e+00 : f32
    %25 = vector.broadcast %cst_17 : f32 to vector<1x8xf32>
    %26 = arith.subf %25, %24 : vector<1x8xf32>
    %27 = math.exp %26 : vector<1x8xf32>
    %cst_18 = arith.constant 1.000000e+00 : f32
    %28 = vector.broadcast %cst_18 : f32 to vector<1x8xf32>
    %29 = arith.addf %28, %27 : vector<1x8xf32>
    %cst_19 = arith.constant 1.000000e+00 : f32
    %30 = vector.broadcast %cst_19 : f32 to vector<1x8xf32>
    %31 = arith.divf %30, %29 : vector<1x8xf32>
    %c0_20 = arith.constant 0 : index
    %c0_21 = arith.constant 0 : index
    %c0_22 = arith.constant 0 : index
    %32 = vector.load %arg8[%c0_20, %c0_21, %c0_22] : memref<1x1x8xf32, #tpu.memory_space<vmem>>, vector<1x1x8xf32>
    %33 = vector.shape_cast %32 : vector<1x1x8xf32> to vector<1x8xf32>
    %34 = vector.shape_cast %31 : vector<1x8xf32> to vector<1x1x8xf32>
    tpu.vector_store %arg8[%c0_20, %c0_21, %c0_22], %34 {strides = array<i32>} : memref<1x1x8xf32, #tpu.memory_space<vmem>>, vector<1x1x8xf32>,
    return
  }
  func.func @transform_0(%arg0: i32) -> (i32, i32) {
    %c0_i32 = arith.constant 0 : i32
    %c0_i32_0 = arith.constant 0 : i32
    return %arg0, %c0_i32 : i32, i32
  }
  func.func @transform_1(%arg0: i32) -> (i32, i32) {
    %c0_i32 = arith.constant 0 : i32
    %c0_i32_0 = arith.constant 0 : i32
    %c0_i32_1 = arith.constant 0 : i32
    return %c0_i32, %c0_i32_0 : i32, i32
  }
  func.func @transform_2(%arg0: i32) -> (i32, i32) {
    %c0_i32 = arith.constant 0 : i32
    %c0_i32_0 = arith.constant 0 : i32
    %c0_i32_1 = arith.constant 0 : i32
    return %c0_i32, %c0_i32_0 : i32, i32
  }
  func.func @transform_3(%arg0: i32) -> (i32, i32) {
    %c0_i32 = arith.constant 0 : i32
    %c0_i32_0 = arith.constant 0 : i32
    %c0_i32_1 = arith.constant 0 : i32
    return %c0_i32, %c0_i32_0 : i32, i32
  }
  func.func @transform_4(%arg0: i32) -> (i32, i32) {
    %c0_i32 = arith.constant 0 : i32
    %c0_i32_0 = arith.constant 0 : i32
    %c0_i32_1 = arith.constant 0 : i32
    return %c0_i32, %c0_i32_0 : i32, i32
  }
  func.func @transform_5(%arg0: i32) -> (i32, i32) {
    %c0_i32 = arith.constant 0 : i32
    %c0_i32_0 = arith.constant 0 : i32
    %c0_i32_1 = arith.constant 0 : i32
    return %c0_i32, %c0_i32_0 : i32, i32
  }
  func.func @transform_6(%arg0: i32) -> (i32, i32) {
    %c0_i32 = arith.constant 0 : i32
    %c0_i32_0 = arith.constant 0 : i32
    %c0_i32_1 = arith.constant 0 : i32
    return %c0_i32, %c0_i32_0 : i32, i32
  }
  func.func @transform_7(%arg0: i32) -> (i32, i32, i32) {
    %c0_i32 = arith.constant 0 : i32
    %c0_i32_0 = arith.constant 0 : i32
    %c0_i32_1 = arith.constant 0 : i32
    return %arg0, %c0_i32, %c0_i32_0 : i32, i32, i32
  }
}

</mosaic_0001>

<bundles_post_ra>
// kernel: tpu_custom_call.1
= control target key start
LH: loop header
LB: loop body
LE: loop exit
PB: predicated region body
PF: predicated region fallthrough
CT: control target
= control target key end

     0   :  { %s406_s0 = inlined_call_operand.vmem [shape: f32[8,32], index: 0, kind: input, shape index: {}]   ;;  %s407_s1 = inlined_call_operand.vmem [shape: bf16[32,64], index: 1, kind: input, shape index: {}]   ;;  %s408_s2 = inlined_call_operand.vmem [shape: f32[1,64], index: 2, kind: input, shape index: {}]   ;;  %s409_s3 = inlined_call_operand.vmem [shape: bf16[64,32], index: 3, kind: input, shape index: {}]   ;;  %s410_s4 = inlined_call_operand.vmem [shape: f32[1,32], index: 4, kind: input, shape index: {}]   ;;  %s411_s5 = inlined_call_operand.vmem [shape: f32[1,32], index: 5, kind: input, shape index: {}]   ;;  %s412_s6 = inlined_call_operand.<no memory space> [shape: f32[1,1], index: 6, kind: input, shape index: {}]   ;;  %s413_s7 = inlined_call_operand.hbm [shape: f32[1,1,8], index: 7, kind: output, shape index: {}]  }
   0x1   :  { %v12_v0 = vstv %s412_s6 }
   0x2   :  { %13 = vst [vmem:[#allocation2] sm:$0x1] %v12_v0 }
   0x3   :  { %v281_v1 = vld [vmem:[%s407_s1] sm:$0xff]   ;;  %v315_v2 = vmov 0.0   ;;  %v282_v3 = vld [vmem:[%s407_s1 + $0x8] sm:$0xff]   ;;  %vm316_vm0 = vmmov 0   ;;  %vm55_vm1 = vcmask 261120  }
   0x4   :  { %256 = vmatprep.subr.bf16.mxu0 %v315_v2  ;;  %264 = vmatprep.subr.bf16.mxu1 %v315_v2  ;;  %v30_v4 = vld [vmem:[%s406_s0] sm:$0xff]  ;;  %v284_v6 = vld [vmem:[%s409_s3 + $0x8] sm:$0xff]  }
   0x5   :  { %257 = vmatpush3.bf16.msra.mxu0 %v281_v1  ;;  %260 = vmatprep.mubr.msk.bf16.mxu0 %vm316_vm0, %v315_v2  ;;  %v283_v5 = vld [vmem:[%s409_s3] sm:$0xff]   ;;  %v31_v7 = vpack.c.bf16 %v30_v4, %v30_v4 }
   0x6   :  { %258 = vmatprep.subr.bf16.mxu0 %v315_v2  ;;  %272 = vmatprep.mubr.msk.bf16.mxu1 %vm316_vm0, %v315_v2 }
   0x7   :  { %265 = vmatpush3.bf16.msra.mxu1 %v283_v5 }
   0x8   :  { %266 = vmatprep.subr.bf16.mxu1 %v315_v2 }
   0x9   :  { %259 = vmatpush3.bf16.msra.mxu0 %v282_v3 }
   0xa   :  { %14 = vsyncpa [#allocation4], 0  ;;  %v285_v8 = vld [vmem:[%s409_s3 + $0x10] sm:$0xff]   ;;  %v286_v9 = vld [vmem:[%s409_s3 + $0x18] sm:$0xff]   ;;  %vm140_vm2 = vcmask 523264   ;;  %v317_v18 = vmov 0   ;;  %v202_v30 = vlaneseq }
   0xb   :  { %267 = vmatpush3.bf16.msra.mxu1 %v284_v6  ;;  %v237_v10 = vld [vmem:[%s408_s2] ss:$0 sm:$0xff]  ;;  %280 = vset.pattern.permute.xlu0 %v317_v18  ;;  %vm221_vm3 = vcmask 57344  }
   0xc   :  { %261 = vmatmul.mubr.msk.bf16.vlgmr.msra.gmra.mrb[0].mxu0 %vm55_vm1, %v31_v7  ;;  %268 = vmatprep.subr.bf16.mxu1 %v315_v2  ;;  %v241_v19 = vld [vmem:[%s410_s4] ss:$0 sm:$0xff]  ;;  %v203_v31 = vshrl.u32 %v202_v30, 7  ;;  %v215_v41 = vand.u32 127, %v202_v30  ;;  %s318_s4 = smov [#allocation3]  }
   0xd   :  { %v247_v24 = vld [vmem:[%s411_s5] ss:$0 sm:$0xff]  ;;  %s229_s5 = sshll.u32 %s318_s4, 4  ;;  %s230_s5 = int_to_ptr.vmem [resolvable:$true] %s229_s5 }
   0xe   :  { %v196_v29 = vld [vmem:[#allocation2] sm:$0x1]  ;;  %v204_v33 = vsub.s32 0, %v203_v31  ;;  %v218_v42 = vsub.s32 %v215_v41, %v203_v31  ;;  %s291_s18 = scalar_lea.vmem %s230_s5, 16  ;;  %s295_s19 = scalar_lea.vmem %s230_s5, 32 }
   0xf   :  { %269 = vmatpush3.bf16.msra.mxu1 %v285_v8  ;;  %p292_p0 = scmp.ne.s32.totalorder %s230_s5, %s291_s18  ;;  %p296_p1 = scmp.lt.s32.totalorder %s230_s5, %s230_s5 }
  0x10   :  { %270 = vmatprep.subr.bf16.mxu1 %v315_v2  ;;  %p297_p2 = scmp.lt.s32.totalorder %s295_s19, %s291_s18 }
  0x12   :  { %p298_p3 = por %p297_p2, %p296_p1 }
  0x13   :  { %271 = vmatpush3.bf16.msra.mxu1 %v286_v9 }
  0x14   :  { %p299_p4 = pnand %p298_p3, %p292_p0 }
  0xdf   :  { %v93_v11 = vpop.f32.mrb[0].mxu0 }
  0xe0   :  { %v94_v12 = vadd.f32 %v237_v10, %v93_v11  ;;  %v262_v13 = vpop.f32.mrb[1].mxu0 }
  0xe1   :  { %v96_v14 = vpop.f32.mrb[2].mxu0 }
  0xe2   :  { %v99_v15 = vmax.f32 %v94_v12, 0.0  ;;  %v263_v16 = vpop.f32.mrb[3].mxu0 }
  0xe4   :  { %v100_v17 = vpack.c.bf16 %v99_v15, %v99_v15 }
  0xe6   :  { %273 = vmatmul.mubr.msk.bf16.vlgmr.msra.gmra.mrb[0].mxu1 %vm140_vm2, %v100_v17 }
 0x1b9   :  { %v178_v20 = vpop.f32.mrb[0].mxu1 }
 0x1ba   :  { %v179_v21 = vadd.f32 %v241_v19, %v178_v20  ;;  %v274_v22 = vpop.f32.mrb[1].mxu1 }
 0x1bb   :  { %v181_v23 = vpop.f32.mrb[2].mxu1 }
 0x1bc   :  { %v184_v25 = vmax.f32 %v179_v21, 0.0  ;;  %v275_v26 = vpop.f32.mrb[3].mxu1 }
 0x1be   :  { %v192_v27 = vmul.f32 %v247_v24, %v184_v25 }
 0x1c0   :  { %v193_v28 = vsel %vm55_vm1, %v192_v27, 0.0 }
 0x1c1   :  { %194 = vadd.xlane.f32.xlu0 %v193_v28 }
 0x1d7   :  { %199 = vperm.xlu0 %280, %v196_v29  }
 0x24e   :  { %v195_v32 = vpop.xlane.xlu0 %194 }
 0x256   :  { %v200_v34 = vpop.permute.xlu0 %199 }
 0x257   :  { %v205_v35 = vrot.slane %v200_v34, %v204_v33 }
 0x259   :  { %v206_v36 = vadd.f32 %v205_v35, %v195_v32 }
 0x25b   :  { %v207_v37 = vsub.f32 0.0, %v206_v36 }
 0x25d   :  { %v208_v38 = vmul.f32 1.442695, %v207_v37 }
 0x25f   :  { %287 = vpow2.f32 %v208_v38 }
 0x269   :  { %v288_v39 = vpop.eup %287 }
 0x26a   :  { %v210_v40 = vadd.f32 1.0, %v288_v39 }
 0x26c   :  { %289 = vrcp.f32 %v210_v40 }
 0x276   :  { %v290_v43 = vpop.eup %289 }
 0x277   :  { %v219_v44 = vrot.slane %v290_v43, %v218_v42 }
 0x279   :  { %222 = vst.msk [vmem:[#allocation3] sm:$0x1] %vm221_vm3, %v219_v44 }
 0x27a   :  { %302 = shalt.err (!%p299_p4)
}
 0x27b   :  { %s303_s22 = scalar_lea.hbm %s413_s7, 16 }
 0x27c   :  { %p304_p5 = scmp.ne.s32.totalorder %s413_s7, %s303_s22  ;;  %p307_p6 = scmp.lt.u32.totalorder %s303_s22, %s413_s7 }
 0x27e   :  { %p309_p7 = pnand %p307_p6, %p304_p5 }
 0x280   :  { %312 = shalt.err (!%p309_p7)
}
 0x281   :  { %232 = dma.vmem_to_hbm [thread:$0]  %s230_s5, 16, %s413_s7, [#allocation4]  }
 0x282   :  { %313 = dma.done.wait [#allocation4], 16  }
 0x283   :  { %314 = vsyncadd [#allocation4], 4294967280 }
 0x284   :  { %236 = vsyncpa [#allocation4], 1 }

// kernel: tpu_custom_call.1
= control target key start
LH: loop header
LB: loop body
LE: loop exit
PB: predicated region body
PF: predicated region fallthrough
CT: control target
= control target key end

     0   :  { %s406_s0 = inlined_call_operand.vmem [shape: f32[8,32], index: 0, kind: input, shape index: {}]   ;;  %s407_s1 = inlined_call_operand.vmem [shape: bf16[32,64], index: 1, kind: input, shape index: {}]   ;;  %s408_s2 = inlined_call_operand.vmem [shape: f32[1,64], index: 2, kind: input, shape index: {}]   ;;  %s409_s3 = inlined_call_operand.vmem [shape: bf16[64,32], index: 3, kind: input, shape index: {}]   ;;  %s410_s4 = inlined_call_operand.vmem [shape: f32[1,32], index: 4, kind: input, shape index: {}]   ;;  %s411_s5 = inlined_call_operand.vmem [shape: f32[1,32], index: 5, kind: input, shape index: {}]   ;;  %s412_s6 = inlined_call_operand.<no memory space> [shape: f32[1,1], index: 6, kind: input, shape index: {}]   ;;  %s413_s7 = inlined_call_operand.hbm [shape: f32[1,1,8], index: 7, kind: output, shape index: {}]  }
   0x1   :  { %v12_v0 = vstv %s412_s6 }
   0x2   :  { %13 = vst [vmem:[#allocation2] sm:$0x1] %v12_v0 }
   0x3   :  { %v281_v1 = vld [vmem:[%s407_s1] sm:$0xff]   ;;  %v315_v2 = vmov 0.0   ;;  %v282_v3 = vld [vmem:[%s407_s1 + $0x8] sm:$0xff]   ;;  %vm316_vm0 = vmmov 0   ;;  %vm55_vm1 = vcmask 261120  }
   0x4   :  { %256 = vmatprep.subr.bf16.mxu0 %v315_v2  ;;  %264 = vmatprep.subr.bf16.mxu1 %v315_v2  ;;  %v30_v4 = vld [vmem:[%s406_s0] sm:$0xff]  ;;  %v284_v6 = vld [vmem:[%s409_s3 + $0x8] sm:$0xff]  }
   0x5   :  { %257 = vmatpush3.bf16.msra.mxu0 %v281_v1  ;;  %260 = vmatprep.mubr.msk.bf16.mxu0 %vm316_vm0, %v315_v2  ;;  %v283_v5 = vld [vmem:[%s409_s3] sm:$0xff]   ;;  %v31_v7 = vpack.c.bf16 %v30_v4, %v30_v4 }
   0x6   :  { %258 = vmatprep.subr.bf16.mxu0 %v315_v2  ;;  %272 = vmatprep.mubr.msk.bf16.mxu1 %vm316_vm0, %v315_v2 }
   0x7   :  { %265 = vmatpush3.bf16.msra.mxu1 %v283_v5 }
   0x8   :  { %266 = vmatprep.subr.bf16.mxu1 %v315_v2 }
   0x9   :  { %259 = vmatpush3.bf16.msra.mxu0 %v282_v3 }
   0xa   :  { %14 = vsyncpa [#allocation4], 0  ;;  %v285_v8 = vld [vmem:[%s409_s3 + $0x10] sm:$0xff]   ;;  %v286_v9 = vld [vmem:[%s409_s3 + $0x18] sm:$0xff]   ;;  %vm140_vm2 = vcmask 523264   ;;  %v317_v18 = vmov 0   ;;  %v202_v30 = vlaneseq }
   0xb   :  { %267 = vmatpush3.bf16.msra.mxu1 %v284_v6  ;;  %v237_v10 = vld [vmem:[%s408_s2] ss:$0 sm:$0xff]  ;;  %280 = vset.pattern.permute.xlu0 %v317_v18  ;;  %vm221_vm3 = vcmask 57344  }
   0xc   :  { %261 = vmatmul.mubr.msk.bf16.vlgmr.msra.gmra.mrb[0].mxu0 %vm55_vm1, %v31_v7  ;;  %268 = vmatprep.subr.bf16.mxu1 %v315_v2  ;;  %v241_v19 = vld [vmem:[%s410_s4] ss:$0 sm:$0xff]  ;;  %v203_v31 = vshrl.u32 %v202_v30, 7  ;;  %v215_v41 = vand.u32 127, %v202_v30  ;;  %s318_s4 = smov [#allocation3]  }
   0xd   :  { %v247_v24 = vld [vmem:[%s411_s5] ss:$0 sm:$0xff]  ;;  %s229_s5 = sshll.u32 %s318_s4, 4  ;;  %s230_s5 = int_to_ptr.vmem [resolvable:$true] %s229_s5 }
   0xe   :  { %v196_v29 = vld [vmem:[#allocation2] sm:$0x1]  ;;  %v204_v33 = vsub.s32 0, %v203_v31  ;;  %v218_v42 = vsub.s32 %v215_v41, %v203_v31  ;;  %s291_s18 = scalar_lea.vmem %s230_s5, 16  ;;  %s295_s19 = scalar_lea.vmem %s230_s5, 32 }
   0xf   :  { %269 = vmatpush3.bf16.msra.mxu1 %v285_v8  ;;  %p292_p0 = scmp.ne.s32.totalorder %s230_s5, %s291_s18  ;;  %p296_p1 = scmp.lt.s32.totalorder %s230_s5, %s230_s5 }
  0x10   :  { %270 = vmatprep.subr.bf16.mxu1 %v315_v2  ;;  %p297_p2 = scmp.lt.s32.totalorder %s295_s19, %s291_s18 }
  0x12   :  { %p298_p3 = por %p297_p2, %p296_p1 }
  0x13   :  { %271 = vmatpush3.bf16.msra.mxu1 %v286_v9 }
  0x14   :  { %p299_p4 = pnand %p298_p3, %p292_p0 }
  0xdf   :  { %v93_v11 = vpop.f32.mrb[0].mxu0 }
  0xe0   :  { %v94_v12 = vadd.f32 %v237_v10, %v93_v11  ;;  %v262_v13 = vpop.f32.mrb[1].mxu0 }
  0xe1   :  { %v96_v14 = vpop.f32.mrb[2].mxu0 }
  0xe2   :  { %v99_v15 = vmax.f32 %v94_v12, 0.0  ;;  %v263_v16 = vpop.f32.mrb[3].mxu0 }
  0xe4   :  { %v100_v17 = vpack.c.bf16 %v99_v15, %v99_v15 }
  0xe6   :  { %273 = vmatmul.mubr.msk.bf16.vlgmr.msra.gmra.mrb[0].mxu1 %vm140_vm2, %v100_v17 }
 0x1b9   :  { %v178_v20 = vpop.f32.mrb[0].mxu1 }
 0x1ba   :  { %v179_v21 = vadd.f32 %v241_v19, %v178_v20  ;;  %v274_v22 = vpop.f32.mrb[1].mxu1 }
 0x1bb   :  { %v181_v23 = vpop.f32.mrb[2].mxu1 }
 0x1bc   :  { %v184_v25 = vmax.f32 %v179_v21, 0.0  ;;  %v275_v26 = vpop.f32.mrb[3].mxu1 }
 0x1be   :  { %v192_v27 = vmul.f32 %v247_v24, %v184_v25 }
 0x1c0   :  { %v193_v28 = vsel %vm55_vm1, %v192_v27, 0.0 }
 0x1c1   :  { %194 = vadd.xlane.f32.xlu0 %v193_v28 }
 0x1d7   :  { %199 = vperm.xlu0 %280, %v196_v29  }
 0x24e   :  { %v195_v32 = vpop.xlane.xlu0 %194 }
 0x256   :  { %v200_v34 = vpop.permute.xlu0 %199 }
 0x257   :  { %v205_v35 = vrot.slane %v200_v34, %v204_v33 }
 0x259   :  { %v206_v36 = vadd.f32 %v205_v35, %v195_v32 }
 0x25b   :  { %v207_v37 = vsub.f32 0.0, %v206_v36 }
 0x25d   :  { %v208_v38 = vmul.f32 1.442695, %v207_v37 }
 0x25f   :  { %287 = vpow2.f32 %v208_v38 }
 0x269   :  { %v288_v39 = vpop.eup %287 }
 0x26a   :  { %v210_v40 = vadd.f32 1.0, %v288_v39 }
 0x26c   :  { %289 = vrcp.f32 %v210_v40 }
 0x276   :  { %v290_v43 = vpop.eup %289 }
 0x277   :  { %v219_v44 = vrot.slane %v290_v43, %v218_v42 }
 0x279   :  { %222 = vst.msk [vmem:[#allocation3] sm:$0x1] %vm221_vm3, %v219_v44 }
 0x27a   :  { %302 = shalt.err (!%p299_p4)
}
 0x27b   :  { %s303_s22 = scalar_lea.hbm %s413_s7, 16 }
 0x27c   :  { %p304_p5 = scmp.ne.s32.totalorder %s413_s7, %s303_s22  ;;  %p307_p6 = scmp.lt.u32.totalorder %s303_s22, %s413_s7 }
 0x27e   :  { %p309_p7 = pnand %p307_p6, %p304_p5 }
 0x280   :  { %312 = shalt.err (!%p309_p7)
}
 0x281   :  { %232 = dma.vmem_to_hbm [thread:$0]  %s230_s5, 16, %s413_s7, [#allocation4]  }
 0x282   :  { %313 = dma.done.wait [#allocation4], 16  }
 0x283   :  { %314 = vsyncadd [#allocation4], 4294967280 }
 0x284   :  { %236 = vsyncpa [#allocation4], 1 }

</bundles_post_ra>
